<compile_context>
chip_gen: v7x
topology: tpu7x:2x2x1
jax: 0.10.0
libtpu: 0.0.40
codegen_flags: <defaults>
</compile_context>

<pallas_src>
import jax
import jax.numpy as jnp
from jax.experimental import pallas as pl
from jax.experimental.pallas import tpu as pltpu


def _round_up(x, m):
    return ((x + m - 1) // m) * m


def logreg_l2_kernel(x_ref, w_ref, b_ref, o_ref):
    x = x_ref[...]                        # (TB, D) f32, streamed tile
    w = w_ref[...]                        # (1, D)  f32, VMEM-resident
    # GEMV as VPU multiply + XLU cross-lane reduce; result laid out lane-dense.
    z = jnp.sum(x * w, axis=-1)[None, :]  # (1, TB)
    z = z + b_ref[0, 0]                   # scalar bias from SMEM
    # Exact sigmoid (exp on EUP); hidden under the DMA stream either way.
    o_ref[...] = 1.0 / (1.0 + jnp.exp(-z))


def logistic_regression_l2(x, weight, bias, *,
                           x_buf_bytes=8 << 20,
                           vmem_limit_bytes=40 << 20):
    """sigmoid(x @ weight.T + bias).

    x: (B, D) f32, weight: (1, D) f32 (PyTorch nn.Linear layout), bias: (1,) f32.
    Returns (B, 1) f32.
    """
    B, D = x.shape
    x = x.astype(jnp.float32)

    # Minimal (8-row) double-buffered x stream must fit the scoped-VMEM limit.
    # TODO(synk): for very wide feature dims add a D (reduction) grid axis with a
    # VMEM accumulator + @pl.when init/finalize instead of asserting here.
    assert 2 * 8 * D * 4 + (2 << 20) <= vmem_limit_bytes, (
        "feature dim too wide for the single-axis batch-tiled kernel")

    # Batch tile: largest multiple of 8 whose single buffer fits x_buf_bytes,
    # rounded down to a multiple of 128 when possible (lane-dense output stores),
    # never exceeding the 8-rounded batch.
    tb_budget = max(8, (x_buf_bytes // (D * 4)) // 8 * 8)
    tb = min(tb_budget, _round_up(B, 8))
    if tb >= 128:
        tb = (tb // 128) * 128
    g = pl.cdiv(B, tb)

    w_row = weight.reshape(1, D).astype(jnp.float32)
    bias2d = bias.reshape(1, 1).astype(jnp.float32)

    cost = pl.CostEstimate(
        flops=2 * B * D,
        transcendentals=B,
        bytes_accessed=(B * D + D + 1 + g * tb) * 4,
    )

    out = pl.pallas_call(
        logreg_l2_kernel,
        out_shape=jax.ShapeDtypeStruct((g, tb), jnp.float32),
        grid=(g,),
        in_specs=[
            pl.BlockSpec((tb, D), lambda i: (i, 0)),            # stream x tiles (ragged tail OK)
            pl.BlockSpec((1, D), lambda i: (0, 0)),             # weight resident in VMEM
            pl.BlockSpec(memory_space=pltpu.MemorySpace.SMEM),  # scalar bias
        ],
        out_specs=pl.BlockSpec((1, tb), lambda i: (i, 0)),      # lane-dense logits
        compiler_params=pltpu.CompilerParams(
            dimension_semantics=("parallel",),                  # 2-TC split on v7x
            vmem_limit_bytes=vmem_limit_bytes),
        cost_estimate=cost,
    )(x, w_row, bias2d)

    # (g, tb) row-major == original batch order; tail-block garbage rows (if
    # B % tb != 0) are dropped by the [:B] slice; restore (B, 1).
    return out.reshape(g * tb, 1)[:B]


if __name__ == "__main__":
    key = jax.random.PRNGKey(0)
    kx, kw, kb = jax.random.split(key, 3)

    batch = 8
    input_dim = 32

    # PyTorch nn.Linear(input_dim, 1): weight (1, input_dim), bias (1,).
    x = jax.random.normal(kx, (batch, input_dim), dtype=jnp.float32)
    weight = jax.random.normal(kw, (1, input_dim), dtype=jnp.float32) * 0.1
    bias = jax.random.normal(kb, (1,), dtype=jnp.float32) * 0.1

    out = logistic_regression_l2(x, weight, bias)
    out = jax.block_until_ready(out)

    # Reference in plain JAX (exact sigmoid; kernel now uses the exact path too).
    ref = jax.nn.sigmoid(x @ weight.T + bias)
    assert out.shape == (batch, 1)
    assert jnp.allclose(out, ref, atol=1e-5, rtol=1e-5)

    print("KERNEL_OK")
</pallas_src>

<mosaic_0001>
module attributes {stable_mosaic.version = 11 : i64} {
  func.func @logreg_l2_kernel(%arg0: i32, %arg1: memref<8x32xf32, #tpu.memory_space<vmem>>, %arg2: memref<1x32xf32, #tpu.memory_space<vmem>>, %arg3: memref<1x1xf32, #tpu.memory_space<smem>>, %arg4: memref<1x8xf32, #tpu.memory_space<vmem>>) attributes {dimension_semantics = [#tpu.dimension_semantics<parallel>], iteration_bounds = array<i64: 1>, scalar_prefetch = 0 : i64, scratch_operands = 0 : i64, tpu.core_type = #tpu.core_type<tc>, window_params = [{transform_indices = @transform_0, window_bounds = array<i64: 8, 32>}, {pipeline_mode = #tpu.pipeline_mode<synchronous>, transform_indices = @transform_1, window_bounds = array<i64: 1, 32>}, {transform_indices = @transform_2, window_bounds = array<i64: 1, 1>}, {transform_indices = @transform_3, window_bounds = array<i64: 1, 8>}]} {
    %c0 = arith.constant 0 : index
    %c0_0 = arith.constant 0 : index
    %0 = vector.load %arg1[%c0, %c0_0] : memref<8x32xf32, #tpu.memory_space<vmem>>, vector<8x32xf32>
    %c0_1 = arith.constant 0 : index
    %c0_2 = arith.constant 0 : index
    %1 = vector.load %arg2[%c0_1, %c0_2] : memref<1x32xf32, #tpu.memory_space<vmem>>, vector<1x32xf32>
    %2 = vector.broadcast %1 : vector<1x32xf32> to vector<8x32xf32>
    %3 = arith.mulf %0, %2 : vector<8x32xf32>
    %cst = arith.constant dense<0.000000e+00> : vector<8xf32>
    %4 = vector.multi_reduction <add>, %3, %cst [1] : vector<8x32xf32> to vector<8xf32>
    %5 = vector.shape_cast %4 : vector<8xf32> to vector<1x8xf32>
    %c0_3 = arith.constant 0 : index
    %c0_4 = arith.constant 0 : index
    %6 = memref.load %arg3[%c0_3, %c0_4] : memref<1x1xf32, #tpu.memory_space<smem>>
    %7 = vector.broadcast %6 : f32 to vector<1x8xf32>
    %8 = arith.addf %5, %7 : vector<1x8xf32>
    %cst_5 = arith.constant 0.000000e+00 : f32
    %9 = vector.broadcast %cst_5 : f32 to vector<1x8xf32>
    %10 = arith.subf %9, %8 : vector<1x8xf32>
    %11 = math.exp %10 : vector<1x8xf32>
    %cst_6 = arith.constant 1.000000e+00 : f32
    %12 = vector.broadcast %cst_6 : f32 to vector<1x8xf32>
    %13 = arith.addf %12, %11 : vector<1x8xf32>
    %cst_7 = arith.constant 1.000000e+00 : f32
    %14 = vector.broadcast %cst_7 : f32 to vector<1x8xf32>
    %15 = arith.divf %14, %13 : vector<1x8xf32>
    %c0_8 = arith.constant 0 : index
    %c0_9 = arith.constant 0 : index
    %16 = vector.load %arg4[%c0_8, %c0_9] : memref<1x8xf32, #tpu.memory_space<vmem>>, vector<1x8xf32>
    tpu.vector_store %arg4[%c0_8, %c0_9], %15 {strides = array<i32>} : memref<1x8xf32, #tpu.memory_space<vmem>>, vector<1x8xf32>,
    return
  }
  func.func @transform_0(%arg0: i32) -> (i32, i32) {
    %c0_i32 = arith.constant 0 : i32
    %c0_i32_0 = arith.constant 0 : i32
    return %arg0, %c0_i32 : i32, i32
  }
  func.func @transform_1(%arg0: i32) -> (i32, i32) {
    %c0_i32 = arith.constant 0 : i32
    %c0_i32_0 = arith.constant 0 : i32
    %c0_i32_1 = arith.constant 0 : i32
    return %c0_i32, %c0_i32_0 : i32, i32
  }
  func.func @transform_2(%arg0: i32) -> (i32, i32) {
    %c0_i32 = arith.constant 0 : i32
    %c0_i32_0 = arith.constant 0 : i32
    %c0_i32_1 = arith.constant 0 : i32
    return %c0_i32, %c0_i32_0 : i32, i32
  }
  func.func @transform_3(%arg0: i32) -> (i32, i32) {
    %c0_i32 = arith.constant 0 : i32
    %c0_i32_0 = arith.constant 0 : i32
    return %arg0, %c0_i32 : i32, i32
  }
}

</mosaic_0001>

<bundles_post_ra>
// kernel: tpu_custom_call.1
= control target key start
LH: loop header
LB: loop body
LE: loop exit
PB: predicated region body
PF: predicated region fallthrough
CT: control target
= control target key end

     0   :  { %9 = vsyncpa [#allocation4], 0  ;;  %s182_s0 = inlined_call_operand.hbm [shape: f32[8,32], index: 0, kind: input, shape index: {}]   ;;  %s183_s1 = inlined_call_operand.vmem [shape: f32[1,32], index: 1, kind: input, shape index: {}]   ;;  %s184_s2 = inlined_call_operand.<no memory space> [shape: f32[1,1], index: 2, kind: input, shape index: {}]   ;;  %s185_s3 = inlined_call_operand.hbm [shape: f32[1,8], index: 3, kind: output, shape index: {}]  }
   0x1   :  { %10 = vsyncpa [#allocation5], 0  ;;  %s130_s12 = smov [#allocation3]   ;;  %s82_s16 = scalar_lea.hbm %s182_s0, 128 }
   0x2   :  { %s17_s13 = sshll.u32 %s130_s12, 4  ;;  %p83_p0 = scmp.ne.s32.totalorder %s182_s0, %s82_s16  ;;  %s18_s13 = int_to_ptr.vmem [resolvable:$true] %s17_s13 }
   0x3   :  { %p86_p1 = scmp.lt.u32.totalorder %s82_s16, %s182_s0 }
   0x5   :  { %p88_p2 = pnand %p86_p1, %p83_p0 }
   0x7   :  { %91 = shalt.err (!%p88_p2)
}
   0x8   :  { %s92_s21 = scalar_lea.vmem %s18_s13, 128  ;;  %p97_p4 = scmp.lt.s32.totalorder %s18_s13, %s18_s13 }
   0x9   :  { %p93_p3 = scmp.ne.s32.totalorder %s18_s13, %s92_s21  ;;  %p98_p5 = scmp.lt.s32.totalorder %s92_s21, %s92_s21 }
   0xb   :  { %p99_p6 = por %p98_p5, %p97_p4 }
   0xd   :  { %p100_p7 = pnand %p99_p6, %p93_p3 }
   0xf   :  { %103 = shalt.err (!%p100_p7)
}
  0x10   :  { %20 = dma.hbm_to_vmem [thread:$0]  %s182_s0, 128, %s18_s13, [#allocation4]  }
  0x11   :  { %126 = dma.done.wait [#allocation4], 128  }
  0x12   :  { %127 = vsyncadd [#allocation4], 4294967168  ;;  %v28_v0 = vld [vmem:[#allocation3] sm:$0xff]  ;;  %vm37_vm0 = vcmask 261120   ;;  %v42_v4 = vstv %s184_s2  ;;  %v51_v11 = vlaneseq  ;;  %s131_s0 = smov [#allocation6]   ;;  %vm58_vm1 = vcmask 57344  }
  0x13   :  { %v75_v1 = vld [vmem:[%s183_s1] ss:$0 sm:$0xff]  ;;  %s66_s1 = sshll.u32 %s131_s0, 4  ;;  %s67_s1 = int_to_ptr.vmem [resolvable:$true] %s66_s1 }
  0x14   :  { %v36_v2 = vmul.f32 %v75_v1, %v28_v0  ;;  %v52_v12 = vand.u32 127, %v51_v11  ;;  %v54_v13 = vshrl.u32 %v51_v11, 7  ;;  %s104_s2 = scalar_lea.vmem %s67_s1, 16  ;;  %s108_s28 = scalar_lea.vmem %s67_s1, 32 }
  0x15   :  { %p105_p8 = scmp.ne.s32.totalorder %s67_s1, %s104_s2  ;;  %p109_p9 = scmp.lt.s32.totalorder %s67_s1, %s67_s1 }
  0x16   :  { %v38_v3 = vsel %vm37_vm0, %v36_v2, 0.0  ;;  %v55_v14 = vsub.s32 %v52_v12, %v54_v13  ;;  %p110_p10 = scmp.lt.s32.totalorder %s108_s28, %s104_s2 }
  0x17   :  { %39 = vadd.xlane.f32.xlu0 %v38_v3 }
  0x18   :  { %p111_p11 = por %p110_p10, %p109_p9 }
  0x1a   :  { %p112_p12 = pnand %p111_p11, %p105_p8 }
  0xa4   :  { %v40_v5 = vpop.xlane.xlu0 %39 }
  0xa5   :  { %v43_v6 = vadd.f32 %v42_v4, %v40_v5 }
  0xa7   :  { %v44_v7 = vsub.f32 0.0, %v43_v6 }
  0xa9   :  { %v45_v8 = vmul.f32 1.442695, %v44_v7 }
  0xab   :  { %78 = vpow2.f32 %v45_v8 }
  0xb5   :  { %v79_v9 = vpop.eup %78 }
  0xb6   :  { %v47_v10 = vadd.f32 1.0, %v79_v9 }
  0xb8   :  { %80 = vrcp.f32 %v47_v10 }
  0xc2   :  { %v81_v15 = vpop.eup %80 }
  0xc3   :  { %v56_v16 = vrot.slane %v81_v15, %v55_v14 }
  0xc5   :  { %59 = vst.msk [vmem:[#allocation6] sm:$0x1] %vm58_vm1, %v56_v16 }
  0xc6   :  { %115 = shalt.err (!%p112_p12)
}
  0xc7   :  { %s116_s4 = scalar_lea.hbm %s185_s3, 16 }
  0xc8   :  { %p117_p13 = scmp.ne.s32.totalorder %s185_s3, %s116_s4  ;;  %p120_p0 = scmp.lt.u32.totalorder %s116_s4, %s185_s3 }
  0xca   :  { %p122_p1 = pnand %p120_p0, %p117_p13 }
  0xcc   :  { %125 = shalt.err (!%p122_p1)
}
  0xcd   :  { %69 = dma.vmem_to_hbm [thread:$0]  %s67_s1, 16, %s185_s3, [#allocation5]  }
  0xce   :  { %128 = dma.done.wait [#allocation5], 16  }
  0xcf   :  { %129 = vsyncadd [#allocation5], 4294967280 }
  0xd0   :  { %73 = vsyncpa [#allocation4], 1 }
  0xd1   :  { %74 = vsyncpa [#allocation5], 1 }

</bundles_post_ra>
